<compile_context>
chip_gen: v7x
topology: tpu7x:2x2x1
jax: 0.10.0
libtpu: 0.0.40
codegen_flags: <defaults>
</compile_context>

<pallas_src>
import math
import jax
import jax.numpy as jnp
from jax import lax
from jax.experimental import pallas as pl
from jax.experimental.pallas import tpu as pltpu

# ----------------------------- model dimensions (small) -----------------------------
N          = 8     # batch (== attention sequence length for the unbatched MHA path)
N_LATENT   = 16
N_HIDDEN   = 32
EMBED_DIM  = 128
NUM_HEADS  = 4
HEAD_DIM   = EMBED_DIM // NUM_HEADS
INPUT_DIM  = 64
LN_EPS     = 1e-4
BN_EPS     = 1e-4
NEG_SLOPE  = 0.01
SCALE      = 1.0 / math.sqrt(HEAD_DIM)

E = EMBED_DIM  # shorthand for the 128-aligned column blocks of the packed weight ref


def _leaky_relu(x):
    return jnp.where(x > 0, x, NEG_SLOPE * x)


def decoder_atac_kernel(x_ref, w_ref, vecs_ref, out_ref):
    # x: (8, 128) f32, columns >= N_LATENT are zero padding.
    x = x_ref[...]

    # Row-vector params (each (1, 128)), packed into one ref.
    b1    = vecs_ref[0:1, :]
    b2    = vecs_ref[1:2, :]
    scale = vecs_ref[2:3, :]   # fused LayerNorm-affine * eval-BatchNorm scale
    shift = vecs_ref[3:4, :]   # fused LayerNorm-affine + eval-BatchNorm shift
    bq    = vecs_ref[4:5, :]   # already multiplied by 1/sqrt(head_dim)
    bk    = vecs_ref[5:6, :]
    bv    = vecs_ref[6:7, :]
    bo    = vecs_ref[7:8, :]
    b3    = vecs_ref[8:9, :]
    # rows 9..12: per-head lane masks

    # 128-aligned column blocks of the packed (128, 896) weight ref.
    w1 = w_ref[:, 0 * E:1 * E]        # Linear(n_latent, n_hidden), zero-padded
    w2 = w_ref[:, 1 * E:2 * E]        # Linear(n_hidden, embed_dim), zero-padded
    # wq*SCALE | wk | wv occupy blocks 2..4 (fused QKV matmul below)
    wo = w_ref[:, 5 * E:6 * E]        # attention out-projection
    w3 = w_ref[:, 6 * E:7 * E]        # Linear(embed_dim, input_dim), zero-padded

    # ---------------- MLP1 ----------------
    h = jnp.dot(x, w1, preferred_element_type=jnp.float32) + b1
    h = _leaky_relu(h)
    h = jnp.dot(h, w2, preferred_element_type=jnp.float32) + b2

    # LayerNorm normalization (eps=1e-4); affine + eval BatchNorm folded into scale/shift
    mu = jnp.mean(h, axis=-1, keepdims=True)
    var = jnp.mean((h - mu) ** 2, axis=-1, keepdims=True)
    h = (h - mu) * lax.rsqrt(var + LN_EPS)
    h = h * scale + shift

    h = _leaky_relu(h)
    # Dropout(p=0.1) is identity in eval mode.

    # -------- MultiheadAttention (unbatched (L, E), Q=K=V=h), fused QKV projection ----
    qkv = jnp.dot(h, w_ref[:, 2 * E:5 * E], preferred_element_type=jnp.float32)  # (L, 3E)
    q = qkv[:, 0:E] + bq          # 128-aligned lane slices: pure vreg selection
    k = qkv[:, E:2 * E] + bk
    v = qkv[:, 2 * E:3 * E] + bv

    # Per-head attention with full-width lane masks (no sub-vreg slices, no concat).
    attn = jnp.zeros((N, EMBED_DIM), jnp.float32)
    for hd in range(NUM_HEADS):
        m = vecs_ref[9 + hd:10 + hd, :]                                  # (1, 128)
        # q*m zeros every lane outside head hd, so contracting over all 128 lanes
        # yields exactly q_h @ k_h^T (scale already folded into q's projection).
        s = lax.dot_general(q * m, k, (((1,), (1,)), ((), ())),
                            preferred_element_type=jnp.float32)          # (L, L)
        s = s - jnp.max(s, axis=-1, keepdims=True)
        p = jnp.exp(s)
        p = p * pl.reciprocal(jnp.sum(p, axis=-1, keepdims=True), approx=True)
        # p @ v is full width; keep only head hd's lanes and accumulate.
        attn = attn + m * jnp.dot(p, v, preferred_element_type=jnp.float32)
    attn = jnp.dot(attn, wo, preferred_element_type=jnp.float32) + bo    # (L, E)

    # ---------------- MLP2 (output padded to 128 lanes -> lane-dense store) ----------
    y = jnp.dot(attn, w3, preferred_element_type=jnp.float32) + b3
    out_ref[...] = jnp.tanh(y)


def make_params(key):
    """Deterministic synthetic parameters (PyTorch-ish scaled normal init)."""
    ks = jax.random.split(key, 12)

    def lin(k, fan_in, fan_out):
        w = jax.random.normal(k, (fan_in, fan_out), jnp.float32) / math.sqrt(fan_in)
        b = jnp.zeros((1, fan_out), jnp.float32)
        return w, b

    w1, b1 = lin(ks[0], N_LATENT, N_HIDDEN)
    w2, b2 = lin(ks[1], N_HIDDEN, EMBED_DIM)
    ln_g = jnp.ones((1, EMBED_DIM), jnp.float32)
    ln_b = jnp.zeros((1, EMBED_DIM), jnp.float32)
    bn_g = jnp.ones((1, EMBED_DIM), jnp.float32)
    bn_b = jnp.zeros((1, EMBED_DIM), jnp.float32)
    bn_m = jnp.zeros((1, EMBED_DIM), jnp.float32)   # running_mean at init
    bn_v = jnp.ones((1, EMBED_DIM), jnp.float32)    # running_var at init
    wq, bq = lin(ks[2], EMBED_DIM, EMBED_DIM)
    wk, bk = lin(ks[3], EMBED_DIM, EMBED_DIM)
    wv, bv = lin(ks[4], EMBED_DIM, EMBED_DIM)
    wo, bo = lin(ks[5], EMBED_DIM, EMBED_DIM)
    w3, b3 = lin(ks[6], EMBED_DIM, INPUT_DIM)

    return (w1, b1, w2, b2, ln_g, ln_b, bn_g, bn_b, bn_m, bn_v,
            wq, bq, wk, bk, wv, bv, wo, bo, w3, b3)


def prepare_params(params):
    """Host-side (one-time) packing:
       * fold LN-affine + eval BatchNorm into per-feature scale/shift,
       * fold 1/sqrt(head_dim) into the Q projection,
       * zero-pad w1/w2/w3 (and b1/b3) to 128-aligned blocks,
       * pack all weights into one (128, 896) ref and all row vectors + head masks
         into one (13, 128) ref."""
    (w1, b1, w2, b2, ln_g, ln_b, bn_g, bn_b, bn_m, bn_v,
     wq, bq, wk, bk, wv, bv, wo, bo, w3, b3) = params

    inv_std = lax.rsqrt(bn_v + BN_EPS)                       # (1, E)
    scale = ln_g * bn_g * inv_std
    shift = (ln_b - bn_m) * bn_g * inv_std + bn_b

    def padw(w):
        out = jnp.zeros((EMBED_DIM, EMBED_DIM), jnp.float32)
        return out.at[:w.shape[0], :w.shape[1]].set(w)

    def padv(b):
        out = jnp.zeros((1, EMBED_DIM), jnp.float32)
        return out.at[:, :b.shape[1]].set(b)

    w_all = jnp.concatenate(
        [padw(w1), padw(w2), wq * SCALE, wk, wv, wo, padw(w3)], axis=1)   # (128, 896)

    lane_head = jnp.arange(EMBED_DIM) // HEAD_DIM                          # (128,)
    masks = (lane_head[None, :] == jnp.arange(NUM_HEADS)[:, None]).astype(jnp.float32)

    vecs = jnp.concatenate(
        [padv(b1), b2, scale, shift, bq * SCALE, bk, bv, bo, padv(b3), masks],
        axis=0)                                                            # (13, 128)

    return (w_all, vecs)


@jax.jit
def decoder_atac_forward(latent, prepared):
    w_all, vecs = prepared
    # Zero-pad latent to 128 lanes so every matmul operand is lane-dense.
    xp = jnp.pad(latent.astype(jnp.float32),
                 ((0, 0), (0, EMBED_DIM - latent.shape[1])))
    vmem = pl.BlockSpec(memory_space=pltpu.MemorySpace.VMEM)
    out_full = pl.pallas_call(
        decoder_atac_kernel,
        out_shape=jax.ShapeDtypeStruct((latent.shape[0], EMBED_DIM), jnp.float32),
        in_specs=[vmem, vmem, vmem],
        out_specs=vmem,
    )(xp, w_all, vecs)
    # Output was computed 128-lanes wide (lane-dense vst); slice back to input_dim.
    return out_full[:, :INPUT_DIM]


if __name__ == "__main__":
    key = jax.random.PRNGKey(0)
    k_x, k_p = jax.random.split(key)
    latent = jax.random.normal(k_x, (N, N_LATENT), jnp.float32)
    params = make_params(k_p)
    prepared = jax.tree_util.tree_map(jax.device_put, prepare_params(params))

    out = decoder_atac_forward(latent, prepared)
    jax.block_until_ready(out)
    assert out.shape == (N, INPUT_DIM)
    assert bool(jnp.all(jnp.isfinite(out)))
    print("KERNEL_OK")
</pallas_src>

<mosaic_0001>
module attributes {stable_mosaic.version = 11 : i64} {
  func.func @decoder_atac_kernel(%arg0: memref<8x128xf32, #tpu.memory_space<vmem>>, %arg1: memref<128x896xf32, #tpu.memory_space<vmem>>, %arg2: memref<13x128xf32, #tpu.memory_space<vmem>>, %arg3: memref<8x128xf32, #tpu.memory_space<vmem>>) attributes {dimension_semantics = [], scalar_prefetch = 0 : i64, scratch_operands = 0 : i64, tpu.core_type = #tpu.core_type<tc>} {
    %c0 = arith.constant 0 : index
    %c0_0 = arith.constant 0 : index
    %0 = vector.load %arg0[%c0, %c0_0] : memref<8x128xf32, #tpu.memory_space<vmem>>, vector<8x128xf32>
    %c0_1 = arith.constant 0 : index
    %c0_2 = arith.constant 0 : index
    %1 = vector.load %arg2[%c0_1, %c0_2] : memref<13x128xf32, #tpu.memory_space<vmem>>, vector<1x128xf32>
    %c1 = arith.constant 1 : index
    %c0_3 = arith.constant 0 : index
    %2 = vector.load %arg2[%c1, %c0_3] : memref<13x128xf32, #tpu.memory_space<vmem>>, vector<1x128xf32>
    %c2 = arith.constant 2 : index
    %c0_4 = arith.constant 0 : index
    %3 = vector.load %arg2[%c2, %c0_4] : memref<13x128xf32, #tpu.memory_space<vmem>>, vector<1x128xf32>
    %c3 = arith.constant 3 : index
    %c0_5 = arith.constant 0 : index
    %4 = vector.load %arg2[%c3, %c0_5] : memref<13x128xf32, #tpu.memory_space<vmem>>, vector<1x128xf32>
    %c4 = arith.constant 4 : index
    %c0_6 = arith.constant 0 : index
    %5 = vector.load %arg2[%c4, %c0_6] : memref<13x128xf32, #tpu.memory_space<vmem>>, vector<1x128xf32>
    %c5 = arith.constant 5 : index
    %c0_7 = arith.constant 0 : index
    %6 = vector.load %arg2[%c5, %c0_7] : memref<13x128xf32, #tpu.memory_space<vmem>>, vector<1x128xf32>
    %c6 = arith.constant 6 : index
    %c0_8 = arith.constant 0 : index
    %7 = vector.load %arg2[%c6, %c0_8] : memref<13x128xf32, #tpu.memory_space<vmem>>, vector<1x128xf32>
    %c7 = arith.constant 7 : index
    %c0_9 = arith.constant 0 : index
    %8 = vector.load %arg2[%c7, %c0_9] : memref<13x128xf32, #tpu.memory_space<vmem>>, vector<1x128xf32>
    %c8 = arith.constant 8 : index
    %c0_10 = arith.constant 0 : index
    %9 = vector.load %arg2[%c8, %c0_10] : memref<13x128xf32, #tpu.memory_space<vmem>>, vector<1x128xf32>
    %c0_11 = arith.constant 0 : index
    %c0_12 = arith.constant 0 : index
    %10 = vector.load %arg1[%c0_11, %c0_12] : memref<128x896xf32, #tpu.memory_space<vmem>>, vector<128x128xf32>
    %c0_13 = arith.constant 0 : index
    %c128 = arith.constant 128 : index
    %11 = vector.load %arg1[%c0_13, %c128] : memref<128x896xf32, #tpu.memory_space<vmem>>, vector<128x128xf32>
    %c0_14 = arith.constant 0 : index
    %c640 = arith.constant 640 : index
    %12 = vector.load %arg1[%c0_14, %c640] : memref<128x896xf32, #tpu.memory_space<vmem>>, vector<128x128xf32>
    %c0_15 = arith.constant 0 : index
    %c768 = arith.constant 768 : index
    %13 = vector.load %arg1[%c0_15, %c768] : memref<128x896xf32, #tpu.memory_space<vmem>>, vector<128x128xf32>
    %cst = arith.constant dense<0.000000e+00> : vector<8x128xf32>
    %14 = tpu.matmul %0, %10, %cst {dimension_numbers = #tpu.dot_dimension_numbers<[1], [0], [0], [1], [0, 0, 1, 1], [], []>} : vector<8x128xf32>, vector<128x128xf32>, vector<8x128xf32> -> vector<8x128xf32>
    %15 = vector.broadcast %1 : vector<1x128xf32> to vector<8x128xf32>
    %16 = arith.addf %14, %15 : vector<8x128xf32>
    %cst_16 = arith.constant 0.000000e+00 : f32
    %17 = vector.broadcast %cst_16 : f32 to vector<8x128xf32>
    %18 = arith.cmpf ogt, %16, %17 : vector<8x128xf32>
    %cst_17 = arith.constant 0.00999999977 : f32
    %19 = vector.broadcast %cst_17 : f32 to vector<8x128xf32>
    %20 = arith.mulf %19, %16 : vector<8x128xf32>
    %21 = arith.select %18, %16, %20 : vector<8x128xi1>, vector<8x128xf32>
    %cst_18 = arith.constant dense<0.000000e+00> : vector<8x128xf32>
    %22 = tpu.matmul %21, %11, %cst_18 {dimension_numbers = #tpu.dot_dimension_numbers<[1], [0], [0], [1], [0, 0, 1, 1], [], []>} : vector<8x128xf32>, vector<128x128xf32>, vector<8x128xf32> -> vector<8x128xf32>
    %23 = vector.broadcast %2 : vector<1x128xf32> to vector<8x128xf32>
    %24 = arith.addf %22, %23 : vector<8x128xf32>
    %cst_19 = arith.constant dense<0.000000e+00> : vector<8xf32>
    %25 = vector.multi_reduction <add>, %24, %cst_19 [1] : vector<8x128xf32> to vector<8xf32>
    %26 = vector.shape_cast %25 : vector<8xf32> to vector<8x1xf32>
    %cst_20 = arith.constant 1.280000e+02 : f32
    %27 = vector.broadcast %cst_20 : f32 to vector<8x1xf32>
    %28 = arith.divf %26, %27 : vector<8x1xf32>
    %29 = vector.broadcast %28 : vector<8x1xf32> to vector<8x128xf32>
    %30 = arith.subf %24, %29 : vector<8x128xf32>
    %31 = arith.mulf %30, %30 : vector<8x128xf32>
    %cst_21 = arith.constant dense<0.000000e+00> : vector<8xf32>
    %32 = vector.multi_reduction <add>, %31, %cst_21 [1] : vector<8x128xf32> to vector<8xf32>
    %33 = vector.shape_cast %32 : vector<8xf32> to vector<8x1xf32>
    %cst_22 = arith.constant 1.280000e+02 : f32
    %34 = vector.broadcast %cst_22 : f32 to vector<8x1xf32>
    %35 = arith.divf %33, %34 : vector<8x1xf32>
    %36 = vector.broadcast %28 : vector<8x1xf32> to vector<8x128xf32>
    %37 = arith.subf %24, %36 : vector<8x128xf32>
    %cst_23 = arith.constant 9.99999974E-5 : f32
    %38 = vector.broadcast %cst_23 : f32 to vector<8x1xf32>
    %39 = arith.addf %35, %38 : vector<8x1xf32>
    %40 = math.rsqrt %39 : vector<8x1xf32>
    %41 = vector.broadcast %40 : vector<8x1xf32> to vector<8x128xf32>
    %42 = arith.mulf %37, %41 : vector<8x128xf32>
    %43 = vector.broadcast %3 : vector<1x128xf32> to vector<8x128xf32>
    %44 = arith.mulf %42, %43 : vector<8x128xf32>
    %45 = vector.broadcast %4 : vector<1x128xf32> to vector<8x128xf32>
    %46 = arith.addf %44, %45 : vector<8x128xf32>
    %cst_24 = arith.constant 0.000000e+00 : f32
    %47 = vector.broadcast %cst_24 : f32 to vector<8x128xf32>
    %48 = arith.cmpf ogt, %46, %47 : vector<8x128xf32>
    %cst_25 = arith.constant 0.00999999977 : f32
    %49 = vector.broadcast %cst_25 : f32 to vector<8x128xf32>
    %50 = arith.mulf %49, %46 : vector<8x128xf32>
    %51 = arith.select %48, %46, %50 : vector<8x128xi1>, vector<8x128xf32>
    %c0_26 = arith.constant 0 : index
    %c256 = arith.constant 256 : index
    %52 = vector.load %arg1[%c0_26, %c256] : memref<128x896xf32, #tpu.memory_space<vmem>>, vector<128x384xf32>
    %cst_27 = arith.constant dense<0.000000e+00> : vector<8x384xf32>
    %53 = tpu.matmul %51, %52, %cst_27 {dimension_numbers = #tpu.dot_dimension_numbers<[1], [0], [0], [1], [0, 0, 1, 1], [], []>} : vector<8x128xf32>, vector<128x384xf32>, vector<8x384xf32> -> vector<8x384xf32>
    %54 = vector.extract_strided_slice %53 {offsets = [0, 0], sizes = [8, 128], strides = [1, 1]} : vector<8x384xf32> to vector<8x128xf32>
    %55 = vector.broadcast %5 : vector<1x128xf32> to vector<8x128xf32>
    %56 = arith.addf %54, %55 : vector<8x128xf32>
    %57 = vector.extract_strided_slice %53 {offsets = [0, 128], sizes = [8, 128], strides = [1, 1]} : vector<8x384xf32> to vector<8x128xf32>
    %58 = vector.broadcast %6 : vector<1x128xf32> to vector<8x128xf32>
    %59 = arith.addf %57, %58 : vector<8x128xf32>
    %60 = vector.extract_strided_slice %53 {offsets = [0, 256], sizes = [8, 128], strides = [1, 1]} : vector<8x384xf32> to vector<8x128xf32>
    %61 = vector.broadcast %7 : vector<1x128xf32> to vector<8x128xf32>
    %62 = arith.addf %60, %61 : vector<8x128xf32>
    %cst_28 = arith.constant 0.000000e+00 : f32
    %63 = vector.broadcast %cst_28 : f32 to vector<8x128xf32>
    %c9 = arith.constant 9 : index
    %c0_29 = arith.constant 0 : index
    %64 = vector.load %arg2[%c9, %c0_29] : memref<13x128xf32, #tpu.memory_space<vmem>>, vector<1x128xf32>
    %65 = vector.broadcast %64 : vector<1x128xf32> to vector<8x128xf32>
    %66 = arith.mulf %56, %65 : vector<8x128xf32>
    %cst_30 = arith.constant dense<0.000000e+00> : vector<8x8xf32>
    %67 = tpu.matmul %66, %59, %cst_30 {dimension_numbers = #tpu.dot_dimension_numbers<[1], [1], [0], [0], [0, 0, 1, 0], [], []>} : vector<8x128xf32>, vector<8x128xf32>, vector<8x8xf32> -> vector<8x8xf32>
    %cst_31 = arith.constant dense<0xFF800000> : vector<8xf32>
    %68 = vector.multi_reduction <maximumf>, %67, %cst_31 [1] : vector<8x8xf32> to vector<8xf32>
    %69 = vector.shape_cast %68 : vector<8xf32> to vector<8x1xf32>
    %70 = vector.broadcast %69 : vector<8x1xf32> to vector<8x8xf32>
    %71 = arith.subf %67, %70 : vector<8x8xf32>
    %72 = math.exp %71 : vector<8x8xf32>
    %cst_32 = arith.constant dense<0.000000e+00> : vector<8xf32>
    %73 = vector.multi_reduction <add>, %72, %cst_32 [1] : vector<8x8xf32> to vector<8xf32>
    %74 = vector.shape_cast %73 : vector<8xf32> to vector<8x1xf32>
    %75 = tpu.reciprocal %74 {approx = true} : vector<8x1xf32> -> vector<8x1xf32>
    %76 = vector.broadcast %75 : vector<8x1xf32> to vector<8x8xf32>
    %77 = arith.mulf %72, %76 : vector<8x8xf32>
    %cst_33 = arith.constant dense<0.000000e+00> : vector<8x128xf32>
    %78 = tpu.matmul %77, %62, %cst_33 {dimension_numbers = #tpu.dot_dimension_numbers<[1], [0], [0], [1], [0, 0, 1, 1], [], []>} : vector<8x8xf32>, vector<8x128xf32>, vector<8x128xf32> -> vector<8x128xf32>
    %79 = vector.broadcast %64 : vector<1x128xf32> to vector<8x128xf32>
    %80 = arith.mulf %79, %78 : vector<8x128xf32>
    %81 = arith.addf %63, %80 : vector<8x128xf32>
    %c10 = arith.constant 10 : index
    %c0_34 = arith.constant 0 : index
    %82 = vector.load %arg2[%c10, %c0_34] : memref<13x128xf32, #tpu.memory_space<vmem>>, vector<1x128xf32>
    %83 = vector.broadcast %82 : vector<1x128xf32> to vector<8x128xf32>
    %84 = arith.mulf %56, %83 : vector<8x128xf32>
    %cst_35 = arith.constant dense<0.000000e+00> : vector<8x8xf32>
    %85 = tpu.matmul %84, %59, %cst_35 {dimension_numbers = #tpu.dot_dimension_numbers<[1], [1], [0], [0], [0, 0, 1, 0], [], []>} : vector<8x128xf32>, vector<8x128xf32>, vector<8x8xf32> -> vector<8x8xf32>
    %cst_36 = arith.constant dense<0xFF800000> : vector<8xf32>
    %86 = vector.multi_reduction <maximumf>, %85, %cst_36 [1] : vector<8x8xf32> to vector<8xf32>
    %87 = vector.shape_cast %86 : vector<8xf32> to vector<8x1xf32>
    %88 = vector.broadcast %87 : vector<8x1xf32> to vector<8x8xf32>
    %89 = arith.subf %85, %88 : vector<8x8xf32>
    %90 = math.exp %89 : vector<8x8xf32>
    %cst_37 = arith.constant dense<0.000000e+00> : vector<8xf32>
    %91 = vector.multi_reduction <add>, %90, %cst_37 [1] : vector<8x8xf32> to vector<8xf32>
    %92 = vector.shape_cast %91 : vector<8xf32> to vector<8x1xf32>
    %93 = tpu.reciprocal %92 {approx = true} : vector<8x1xf32> -> vector<8x1xf32>
    %94 = vector.broadcast %93 : vector<8x1xf32> to vector<8x8xf32>
    %95 = arith.mulf %90, %94 : vector<8x8xf32>
    %cst_38 = arith.constant dense<0.000000e+00> : vector<8x128xf32>
    %96 = tpu.matmul %95, %62, %cst_38 {dimension_numbers = #tpu.dot_dimension_numbers<[1], [0], [0], [1], [0, 0, 1, 1], [], []>} : vector<8x8xf32>, vector<8x128xf32>, vector<8x128xf32> -> vector<8x128xf32>
    %97 = vector.broadcast %82 : vector<1x128xf32> to vector<8x128xf32>
    %98 = arith.mulf %97, %96 : vector<8x128xf32>
    %99 = arith.addf %81, %98 : vector<8x128xf32>
    %c11 = arith.constant 11 : index
    %c0_39 = arith.constant 0 : index
    %100 = vector.load %arg2[%c11, %c0_39] : memref<13x128xf32, #tpu.memory_space<vmem>>, vector<1x128xf32>
    %101 = vector.broadcast %100 : vector<1x128xf32> to vector<8x128xf32>
    %102 = arith.mulf %56, %101 : vector<8x128xf32>
    %cst_40 = arith.constant dense<0.000000e+00> : vector<8x8xf32>
    %103 = tpu.matmul %102, %59, %cst_40 {dimension_numbers = #tpu.dot_dimension_numbers<[1], [1], [0], [0], [0, 0, 1, 0], [], []>} : vector<8x128xf32>, vector<8x128xf32>, vector<8x8xf32> -> vector<8x8xf32>
    %cst_41 = arith.constant dense<0xFF800000> : vector<8xf32>
    %104 = vector.multi_reduction <maximumf>, %103, %cst_41 [1] : vector<8x8xf32> to vector<8xf32>
    %105 = vector.shape_cast %104 : vector<8xf32> to vector<8x1xf32>
    %106 = vector.broadcast %105 : vector<8x1xf32> to vector<8x8xf32>
    %107 = arith.subf %103, %106 : vector<8x8xf32>
    %108 = math.exp %107 : vector<8x8xf32>
    %cst_42 = arith.constant dense<0.000000e+00> : vector<8xf32>
    %109 = vector.multi_reduction <add>, %108, %cst_42 [1] : vector<8x8xf32> to vector<8xf32>
    %110 = vector.shape_cast %109 : vector<8xf32> to vector<8x1xf32>
    %111 = tpu.reciprocal %110 {approx = true} : vector<8x1xf32> -> vector<8x1xf32>
    %112 = vector.broadcast %111 : vector<8x1xf32> to vector<8x8xf32>
    %113 = arith.mulf %108, %112 : vector<8x8xf32>
    %cst_43 = arith.constant dense<0.000000e+00> : vector<8x128xf32>
    %114 = tpu.matmul %113, %62, %cst_43 {dimension_numbers = #tpu.dot_dimension_numbers<[1], [0], [0], [1], [0, 0, 1, 1], [], []>} : vector<8x8xf32>, vector<8x128xf32>, vector<8x128xf32> -> vector<8x128xf32>
    %115 = vector.broadcast %100 : vector<1x128xf32> to vector<8x128xf32>
    %116 = arith.mulf %115, %114 : vector<8x128xf32>
    %117 = arith.addf %99, %116 : vector<8x128xf32>
    %c12 = arith.constant 12 : index
    %c0_44 = arith.constant 0 : index
    %118 = vector.load %arg2[%c12, %c0_44] : memref<13x128xf32, #tpu.memory_space<vmem>>, vector<1x128xf32>
    %119 = vector.broadcast %118 : vector<1x128xf32> to vector<8x128xf32>
    %120 = arith.mulf %56, %119 : vector<8x128xf32>
    %cst_45 = arith.constant dense<0.000000e+00> : vector<8x8xf32>
    %121 = tpu.matmul %120, %59, %cst_45 {dimension_numbers = #tpu.dot_dimension_numbers<[1], [1], [0], [0], [0, 0, 1, 0], [], []>} : vector<8x128xf32>, vector<8x128xf32>, vector<8x8xf32> -> vector<8x8xf32>
    %cst_46 = arith.constant dense<0xFF800000> : vector<8xf32>
    %122 = vector.multi_reduction <maximumf>, %121, %cst_46 [1] : vector<8x8xf32> to vector<8xf32>
    %123 = vector.shape_cast %122 : vector<8xf32> to vector<8x1xf32>
    %124 = vector.broadcast %123 : vector<8x1xf32> to vector<8x8xf32>
    %125 = arith.subf %121, %124 : vector<8x8xf32>
    %126 = math.exp %125 : vector<8x8xf32>
    %cst_47 = arith.constant dense<0.000000e+00> : vector<8xf32>
    %127 = vector.multi_reduction <add>, %126, %cst_47 [1] : vector<8x8xf32> to vector<8xf32>
    %128 = vector.shape_cast %127 : vector<8xf32> to vector<8x1xf32>
    %129 = tpu.reciprocal %128 {approx = true} : vector<8x1xf32> -> vector<8x1xf32>
    %130 = vector.broadcast %129 : vector<8x1xf32> to vector<8x8xf32>
    %131 = arith.mulf %126, %130 : vector<8x8xf32>
    %cst_48 = arith.constant dense<0.000000e+00> : vector<8x128xf32>
    %132 = tpu.matmul %131, %62, %cst_48 {dimension_numbers = #tpu.dot_dimension_numbers<[1], [0], [0], [1], [0, 0, 1, 1], [], []>} : vector<8x8xf32>, vector<8x128xf32>, vector<8x128xf32> -> vector<8x128xf32>
    %133 = vector.broadcast %118 : vector<1x128xf32> to vector<8x128xf32>
    %134 = arith.mulf %133, %132 : vector<8x128xf32>
    %135 = arith.addf %117, %134 : vector<8x128xf32>
    %cst_49 = arith.constant dense<0.000000e+00> : vector<8x128xf32>
    %136 = tpu.matmul %135, %12, %cst_49 {dimension_numbers = #tpu.dot_dimension_numbers<[1], [0], [0], [1], [0, 0, 1, 1], [], []>} : vector<8x128xf32>, vector<128x128xf32>, vector<8x128xf32> -> vector<8x128xf32>
    %137 = vector.broadcast %8 : vector<1x128xf32> to vector<8x128xf32>
    %138 = arith.addf %136, %137 : vector<8x128xf32>
    %cst_50 = arith.constant dense<0.000000e+00> : vector<8x128xf32>
    %139 = tpu.matmul %138, %13, %cst_50 {dimension_numbers = #tpu.dot_dimension_numbers<[1], [0], [0], [1], [0, 0, 1, 1], [], []>} : vector<8x128xf32>, vector<128x128xf32>, vector<8x128xf32> -> vector<8x128xf32>
    %140 = vector.broadcast %9 : vector<1x128xf32> to vector<8x128xf32>
    %141 = arith.addf %139, %140 : vector<8x128xf32>
    %142 = math.tanh %141 : vector<8x128xf32>
    %c0_51 = arith.constant 0 : index
    %c0_52 = arith.constant 0 : index
    %143 = vector.load %arg3[%c0_51, %c0_52] : memref<8x128xf32, #tpu.memory_space<vmem>>, vector<8x128xf32>
    tpu.vector_store %arg3[%c0_51, %c0_52], %142 {strides = array<i32>} : memref<8x128xf32, #tpu.memory_space<vmem>>, vector<8x128xf32>,
    return
  }
}

</mosaic_0001>

<bundles_post_ra>
// kernel: decoder_atac_forward.1
= control target key start
LH: loop header
LB: loop body
LE: loop exit
PB: predicated region body
PF: predicated region fallthrough
CT: control target
= control target key end

     0   :  { %8 = vsyncpa [#allocation3], 0  ;;  %s2064_s0 = inlined_call_operand.vmem [shape: f32[8,128], index: 0, kind: input, shape index: {}]   ;;  %s2065_s1 = inlined_call_operand.hbm [shape: f32[128,896], index: 1, kind: input, shape index: {}]   ;;  %s2066_s2 = inlined_call_operand.vmem [shape: f32[13,128], index: 2, kind: input, shape index: {}]   ;;  %s2067_s3 = inlined_call_operand.hbm [shape: f32[8,128], index: 3, kind: output, shape index: {}]  }
   0x1   :  { %9 = vsyncpa [#allocation4], 0  ;;  %s1857_s12 = smov [#allocation2]   ;;  %s1809_s16 = scalar_lea.hbm %s2065_s1, 14336 }
   0x2   :  { %s17_s13 = sshll.u32 %s1857_s12, 4  ;;  %p1810_p0 = scmp.ne.s32.totalorder %s2065_s1, %s1809_s16  ;;  %s18_s13 = int_to_ptr.vmem [resolvable:$true] %s17_s13 }
   0x3   :  { %p1813_p1 = scmp.lt.u32.totalorder %s1809_s16, %s2065_s1 }
   0x5   :  { %p1815_p2 = pnand %p1813_p1, %p1810_p0 }
   0x7   :  { %1818 = shalt.err (!%p1815_p2)
}
   0x8   :  { %s1819_s21 = scalar_lea.vmem %s18_s13, 14336  ;;  %p1824_p4 = scmp.lt.s32.totalorder %s18_s13, %s18_s13 }
   0x9   :  { %p1820_p3 = scmp.ne.s32.totalorder %s18_s13, %s1819_s21  ;;  %p1825_p5 = scmp.lt.s32.totalorder %s1819_s21, %s1819_s21 }
   0xb   :  { %p1826_p6 = por %p1825_p5, %p1824_p4 }
   0xd   :  { %p1827_p7 = pnand %p1826_p6, %p1820_p3 }
   0xf   :  { %1830 = shalt.err (!%p1827_p7)
}
  0x10   :  { %s1858_s22 = smov 896   ;;  %s1859_s23 = smov 56  }
  0x11   :  { %23 = dma.hbm_to_vmem [thread:$0]  %s2065_s1, 14336, %s18_s13, [#allocation3], %s1858_s22, %s1858_s22, %s1859_s23  }
  0x12   :  { %1853 = dma.done.wait [#allocation3], 14336  }
  0x13   :  { %1854 = vsyncadd [#allocation3], 4294952960  ;;  %v1860_v0 = vmov 0.0|0.0   ;;  %vm1861_vm0 = vmmov 0   ;;  %v1862_v1 = vmov 0.0   ;;  %v39_v2 = vld [vmem:[#allocation2] sm:$0xff] }
  0x14   :  { %1630 = vmatprep.subr.bf16.mxu0 %v1860_v0  ;;  %1447 = vmatprep.mubr.msk.f32.mxu0 %vm1861_vm0, %v1862_v1  ;;  %v40_v3 = vld [vmem:[#allocation2 + $0x38] sm:$0xff]  ;;  %v41_v4 = vld [vmem:[#allocation2 + $0x70] sm:$0xff]  ;;  %v42_v6 = vld [vmem:[#allocation2 + $0xa8] sm:$0xff]  ;;  %vm559_vm3 = vcmask 64512   ;;  %s1863_s25 = smov [#allocation5]  }
  0x15   :  { %1654 = vmatprep.subr.bf16.mxu1 %v1860_v0  ;;  %1482 = vmatprep.mubr.msk.f32.mxu1 %vm1861_vm0, %v1862_v1  ;;  %v1631_v5 = vpack.c.bf16 %v40_v3, %v39_v2  ;;  %v1634_v7 = vpack.c.bf16 %v42_v6, %v41_v4  ;;  %v43_v8 = vld [vmem:[#allocation2 + $0xe0] sm:$0xff]  ;;  %v44_v9 = vld [vmem:[#allocation2 + $0x118] sm:$0xff]  ;;  %v55_v10 = vld [vmem:[#allocation2 + $0x8] sm:$0xff]  ;;  %s1288_s1 = sshll.u32 %s1863_s25, 4  ;;  %s1289_s1 = int_to_ptr.vmem [resolvable:$true] %s1288_s1 }
  0x16   :  { %v56_v11 = vld [vmem:[#allocation2 + $0x40] sm:$0xff]  ;;  %v57_v12 = vld [vmem:[#allocation2 + $0x78] sm:$0xff]  ;;  %v58_v13 = vld [vmem:[#allocation2 + $0xb0] sm:$0xff]  ;;  %v1637_v14 = vpack.c.bf16 %v44_v9, %v43_v8  ;;  %s1831_s26 = scalar_lea.vmem %s1289_s1, 128  ;;  %p1836_p9 = scmp.lt.s32.totalorder %s1289_s1, %s1289_s1 }
  0x17   :  { %1632 = vmatpush3.bf16.msra.mxu0 %v1631_v5  ;;  %v1655_v15 = vpack.c.bf16 %v56_v11, %v55_v10  ;;  %v45_v16 = vld [vmem:[#allocation2 + $0x150] sm:$0xff]  ;;  %v46_v17 = vld [vmem:[#allocation2 + $0x188] sm:$0xff]  ;;  %v1658_v18 = vpack.c.bf16 %v58_v13, %v57_v12  ;;  %v60_v20 = vld [vmem:[#allocation2 + $0x120] sm:$0xff]  ;;  %p1832_p8 = scmp.ne.s32.totalorder %s1289_s1, %s1831_s26  ;;  %p1837_p10 = scmp.lt.s32.totalorder %s1831_s26, %s1831_s26 }
  0x18   :  { %1633 = vmatprep.subr.bf16.mxu0 %v1860_v0  ;;  %v59_v19 = vld [vmem:[#allocation2 + $0xe8] sm:$0xff]  ;;  %v1640_v21 = vpack.c.bf16 %v46_v17, %v45_v16  ;;  %v47_v22 = vld [vmem:[#allocation2 + $0x1c0] sm:$0xff]  ;;  %v48_v23 = vld [vmem:[#allocation2 + $0x1f8] sm:$0xff] }
  0x19   :  { %1656 = vmatpush3.bf16.msra.mxu1 %v1655_v15  ;;  %v1661_v24 = vpack.c.bf16 %v60_v20, %v59_v19  ;;  %v61_v25 = vld [vmem:[#allocation2 + $0x158] sm:$0xff]  ;;  %v62_v26 = vld [vmem:[#allocation2 + $0x190] sm:$0xff]  ;;  %v1643_v27 = vpack.c.bf16 %v48_v23, %v47_v22  ;;  %v50_v29 = vld [vmem:[#allocation2 + $0x268] sm:$0xff]  ;;  %p1838_p11 = por %p1837_p10, %p1836_p9 }
  0x1a   :  { %1657 = vmatprep.subr.bf16.mxu1 %v1860_v0  ;;  %v49_v28 = vld [vmem:[#allocation2 + $0x230] sm:$0xff]  ;;  %v1664_v30 = vpack.c.bf16 %v62_v26, %v61_v25  ;;  %v63_v31 = vld [vmem:[#allocation2 + $0x1c8] sm:$0xff]  ;;  %v64_v32 = vld [vmem:[#allocation2 + $0x200] sm:$0xff] }
  0x1b   :  { %1635 = vmatpush3.bf16.msra.mxu0 %v1634_v7  ;;  %v1646_v33 = vpack.c.bf16 %v50_v29, %v49_v28  ;;  %v51_v34 = vld [vmem:[#allocation2 + $0x2a0] sm:$0xff]  ;;  %v52_v35 = vld [vmem:[#allocation2 + $0x2d8] sm:$0xff]  ;;  %v1667_v36 = vpack.c.bf16 %v64_v32, %v63_v31  ;;  %v66_v38 = vld [vmem:[#allocation2 + $0x270] sm:$0xff]  ;;  %p1839_p12 = pnand %p1838_p11, %p1832_p8 }
  0x1c   :  { %1636 = vmatprep.subr.bf16.mxu0 %v1860_v0  ;;  %v65_v37 = vld [vmem:[#allocation2 + $0x238] sm:$0xff]  ;;  %v1649_v39 = vpack.c.bf16 %v52_v35, %v51_v34  ;;  %v53_v40 = vld [vmem:[#allocation2 + $0x310] sm:$0xff]  ;;  %v54_v41 = vld [vmem:[#allocation2 + $0x348] sm:$0xff] }
  0x1d   :  { %1659 = vmatpush3.bf16.msra.mxu1 %v1658_v18  ;;  %v1670_v42 = vpack.c.bf16 %v66_v38, %v65_v37  ;;  %v67_v43 = vld [vmem:[#allocation2 + $0x2a8] sm:$0xff]  ;;  %v68_v44 = vld [vmem:[#allocation2 + $0x2e0] sm:$0xff]  ;;  %v1652_v45 = vpack.c.bf16 %v54_v41, %v53_v40  ;;  %v69_v48 = vld [vmem:[#allocation2 + $0x318] sm:$0xff] }
  0x1e   :  { %1660 = vmatprep.subr.bf16.mxu1 %v1860_v0  ;;  %v1673_v46 = vpack.c.bf16 %v68_v44, %v67_v43  ;;  %v29_v47 = vld [vmem:[%s2064_s0] sm:$0xff]  ;;  %v70_v49 = vld [vmem:[#allocation2 + $0x350] sm:$0xff]  ;;  %v280_v61 = vld [vmem:[#allocation2 + $0x18] sm:$0xff] }
  0x1f   :  { %1638 = vmatpush3.bf16.msra.mxu0 %v1637_v14  ;;  %v1676_v50 = vpack.c.bf16 %v70_v49, %v69_v48  ;;  %v1297_v51 = vld [vmem:[%s2066_s2] ss:$0 sm:$0xff]  ;;  %v1298_v57 = vld [vmem:[%s2066_s2 + $0x1] ss:$0 sm:$0xff]  ;;  %v283_v62 = vld [vmem:[#allocation2 + $0x50] sm:$0xff] }
  0x20   :  { %1639 = vmatprep.subr.bf16.mxu0 %v1860_v0  ;;  %v279_v63 = vld [vmem:[#allocation2 + $0x10] sm:$0xff]  ;;  %v1678_v2 = vpack.c.bf16 %v283_v62, %v280_v61  ;;  %v282_v3 = vld [vmem:[#allocation2 + $0x48] sm:$0xff]  ;;  %v281_v4 = vld [vmem:[#allocation2 + $0x20] sm:$0xff] }
  0x21   :  { %1662 = vmatpush3.bf16.msra.mxu1 %v1661_v24  ;;  %v284_v5 = vld [vmem:[#allocation2 + $0x58] sm:$0xff]  ;;  %v1680_v6 = vpack.c.bf16 %v282_v3, %v279_v63  ;;  %v286_v8 = vld [vmem:[#allocation2 + $0x88] sm:$0xff]  ;;  %v289_v9 = vld [vmem:[#allocation2 + $0xc0] sm:$0xff] }
  0x22   :  { %1663 = vmatprep.subr.bf16.mxu1 %v1860_v0  ;;  %v1711_v7 = vpack.c.bf16 %v284_v5, %v281_v4  ;;  %v285_v10 = vld [vmem:[#allocation2 + $0x80] sm:$0xff]  ;;  %v1682_v11 = vpack.c.bf16 %v289_v9, %v286_v8  ;;  %v288_v12 = vld [vmem:[#allocation2 + $0xb8] sm:$0xff]  ;;  %v287_v13 = vld [vmem:[#allocation2 + $0x90] sm:$0xff] }
  0x23   :  { %1641 = vmatpush3.bf16.msra.mxu0 %v1640_v21  ;;  %v290_v14 = vld [vmem:[#allocation2 + $0xc8] sm:$0xff]  ;;  %v1684_v15 = vpack.c.bf16 %v288_v12, %v285_v10  ;;  %v292_v21 = vld [vmem:[#allocation2 + $0xf8] sm:$0xff]  ;;  %v295_v22 = vld [vmem:[#allocation2 + $0x130] sm:$0xff] }
  0x24   :  { %1642 = vmatprep.subr.bf16.mxu0 %v1860_v0  ;;  %v1714_v16 = vpack.c.bf16 %v290_v14, %v287_v13  ;;  %v1686_v23 = vpack.c.bf16 %v295_v22, %v292_v21  ;;  %v291_v24 = vld [vmem:[#allocation2 + $0xf0] sm:$0xff]  ;;  %v294_v25 = vld [vmem:[#allocation2 + $0x128] sm:$0xff]  ;;  %v293_v26 = vld [vmem:[#allocation2 + $0x100] sm:$0xff] }
  0x25   :  { %1665 = vmatpush3.bf16.msra.mxu1 %v1664_v30  ;;  %v296_v28 = vld [vmem:[#allocation2 + $0x138] sm:$0xff]  ;;  %v298_v30 = vld [vmem:[#allocation2 + $0x168] sm:$0xff]  ;;  %v301_v31 = vld [vmem:[#allocation2 + $0x1a0] sm:$0xff] }
  0x26   :  { %1666 = vmatprep.subr.bf16.mxu1 %v1860_v0  ;;  %v1717_v29 = vpack.c.bf16 %v296_v28, %v293_v26  ;;  %v1690_v32 = vpack.c.bf16 %v301_v31, %v298_v30  ;;  %v300_v34 = vld [vmem:[#allocation2 + $0x198] sm:$0xff]  ;;  %v299_v35 = vld [vmem:[#allocation2 + $0x170] sm:$0xff]  ;;  %v302_v37 = vld [vmem:[#allocation2 + $0x1a8] sm:$0xff] }
  0x27   :  { %1644 = vmatpush3.bf16.msra.mxu0 %v1643_v27  ;;  %v1688_v27 = vpack.c.bf16 %v294_v25, %v291_v24  ;;  %v1720_v38 = vpack.c.bf16 %v302_v37, %v299_v35  ;;  %v307_v40 = vld [vmem:[#allocation2 + $0x210] sm:$0xff]  ;;  %v306_v43 = vld [vmem:[#allocation2 + $0x208] sm:$0xff]  ;;  %v305_v44 = vld [vmem:[#allocation2 + $0x1e0] sm:$0xff] }
  0x28   :  { %1645 = vmatprep.subr.bf16.mxu0 %v1860_v0  ;;  %v303_v41 = vld [vmem:[#allocation2 + $0x1d0] sm:$0xff]  ;;  %v310_v48 = vld [vmem:[#allocation2 + $0x248] sm:$0xff]  ;;  %v313_v49 = vld [vmem:[#allocation2 + $0x280] sm:$0xff] }
  0x29   :  { %1668 = vmatpush3.bf16.msra.mxu1 %v1667_v36  ;;  %v318_v61 = vld [vmem:[#allocation2 + $0x2e8] sm:$0xff]  ;;  %v317_v62 = vld [vmem:[#allocation2 + $0x2c0] sm:$0xff]  ;;  %v320_v63 = vld [vmem:[#allocation2 + $0x2f8] sm:$0xff] }
  0x2a   :  { %1669 = vmatprep.subr.bf16.mxu1 %v1860_v0  ;;  %v325_v3 = vld [vmem:[#allocation2 + $0x360] sm:$0xff]  ;;  %v1729_v5 = vpack.c.bf16 %v320_v63, %v317_v62  ;;  %v324_v8 = vld [vmem:[#allocation2 + $0x358] sm:$0xff]  ;;  %v323_v9 = vld [vmem:[#allocation2 + $0x330] sm:$0xff] }
  0x2b   :  { %1647 = vmatpush3.bf16.msra.mxu0 %v1646_v33  ;;  %v297_v33 = vld [vmem:[#allocation2 + $0x160] sm:$0xff]  ;;  %v326_v10 = vld [vmem:[#allocation2 + $0x368] sm:$0xff] }
  0x2c   :  { %1648 = vmatprep.subr.bf16.mxu0 %v1860_v0  ;;  %v1692_v36 = vpack.c.bf16 %v300_v34, %v297_v33  ;;  %v1732_v12 = vpack.c.bf16 %v326_v10, %v323_v9  ;;  %v1303_v25 = vld [vmem:[%s2066_s2 + $0x6] ss:$0 sm:$0xff]  ;;  %v1302_v26 = vld [vmem:[%s2066_s2 + $0x5] ss:$0 sm:$0xff]  ;;  %v1967_v34 = vld [vmem:[%s2066_s2 + $0x9] ss:$0 sm:$0xff] }
  0x2d   :  { %1671 = vmatpush3.bf16.msra.mxu1 %v1670_v42 }
  0x2e   :  { %1672 = vmatprep.subr.bf16.mxu1 %v1860_v0 }
  0x2f   :  { %1650 = vmatpush3.bf16.msra.mxu0 %v1649_v39  ;;  %v304_v39 = vld [vmem:[#allocation2 + $0x1d8] sm:$0xff] }
  0x30   :  { %1651 = vmatprep.subr.bf16.mxu0 %v1860_v0  ;;  %v1694_v42 = vpack.c.bf16 %v307_v40, %v304_v39  ;;  %v1994_v40 = vld [vmem:[%s2066_s2 + $0xc] ss:$0 sm:$0xff] }
  0x31   :  { %1674 = vmatpush3.bf16.msra.mxu1 %v1673_v46  ;;  %v1696_v46 = vpack.c.bf16 %v306_v43, %v303_v41 }
  0x32   :  { %1675 = vmatprep.subr.bf16.mxu1 %v1860_v0 }
  0x33   :  { %1653 = vmatpush3.bf16.msra.mxu0 %v1652_v45  ;;  %v308_v45 = vld [vmem:[#allocation2 + $0x218] sm:$0xff] }
  0x34   :  { %1679 = vmatprep.subr.bf16.mxu0 %v1678_v2  ;;  %v322_v2 = vld [vmem:[#allocation2 + $0x328] sm:$0xff] }
  0x35   :  { %1677 = vmatpush3.bf16.msra.mxu1 %v1676_v50  ;;  %v309_v50 = vld [vmem:[#allocation2 + $0x240] sm:$0xff] }
  0x36   :  { %1448 = vmatmul.mubr.f32.vlgmr.msra.gmra.mrb[0].mxu0 %v29_v47  ;;  %1710 = vmatprep.subr.bf16.mxu1 %v1860_v0  ;;  %v1723_v47 = vpack.c.bf16 %v308_v45, %v305_v44 }
  0x37   :  { %391 = vmatprep.mubr.f32.mxu0 %v1862_v1  ;;  %1681 = vmatpush1.bf16.msra.mxu0 %v1680_v6  ;;  %v1706_v6 = vpack.c.bf16 %v325_v3, %v322_v2 }
  0x38   :  { %1683 = vmatprep.subr.bf16.mxu0 %v1682_v11 }
  0x3b   :  { %1685 = vmatpush1.bf16.msra.mxu0 %v1684_v15 }
  0x3c   :  { %1687 = vmatprep.subr.bf16.mxu0 %v1686_v23 }
  0x3f   :  { %1689 = vmatpush1.bf16.msra.mxu0 %v1688_v27 }
  0x40   :  { %1691 = vmatprep.subr.bf16.mxu0 %v1690_v32 }
  0x43   :  { %1693 = vmatpush1.bf16.msra.mxu0 %v1692_v36  ;;  %v1976_v36 = vld [vmem:[%s2066_s2 + $0xa] ss:$0 sm:$0xff] }
  0x44   :  { %1695 = vmatprep.subr.bf16.mxu0 %v1694_v42 }
  0x47   :  { %1697 = vmatpush1.bf16.msra.mxu0 %v1696_v46 }
 0x109   :  { %v173_v52 = vpop.f32.mrb[0].mxu0 }
 0x10a   :  { %v174_v53 = vadd.f32 %v1297_v51, %v173_v52  ;;  %v1449_v54 = vpop.f32.mrb[1].mxu0  ;;  %v1698_v51 = vpack.c.bf16 %v313_v49, %v310_v48  ;;  %v312_v52 = vld [vmem:[#allocation2 + $0x278] sm:$0xff] }
 0x10b   :  { %v314_v54 = vld [vmem:[#allocation2 + $0x288] sm:$0xff] }
 0x10c   :  { %v178_v55 = vmul.f32 0.01, %v174_v53  ;;  %vm177_vm1 = vcmp.gt.f32.partialorder %v174_v53, 0.0  ;;  %1699 = vmatprep.subr.bf16.mxu0 %v1698_v51 }
 0x10e   :  { %v179_v56 = vsel %vm177_vm1, %v174_v53, %v178_v55  ;;  %v311_v53 = vld [vmem:[#allocation2 + $0x250] sm:$0xff]  ;;  %v316_v55 = vld [vmem:[#allocation2 + $0x2b8] sm:$0xff] }
 0x10f   :  { %1483 = vmatmul.mubr.f32.vlgmr.msra.gmra.mrb[0].mxu1 %v179_v56  ;;  %v319_v56 = vld [vmem:[#allocation2 + $0x2f0] sm:$0xff] }
 0x110   :  { %1517 = vmatprep.mubr.msk.f32.mxu1 %vm1861_vm0, %v1862_v1  ;;  %1712 = vmatpush3.bf16.msra.mxu1 %v1711_v7  ;;  %v321_v7 = vld [vmem:[#allocation2 + $0x320] sm:$0xff] }
 0x111   :  { %1713 = vmatprep.subr.bf16.mxu1 %v1860_v0  ;;  %v1708_v11 = vpack.c.bf16 %v324_v8, %v321_v7 }
 0x114   :  { %1715 = vmatpush3.bf16.msra.mxu1 %v1714_v16 }
 0x115   :  { %1716 = vmatprep.subr.bf16.mxu1 %v1860_v0 }
 0x118   :  { %1718 = vmatpush3.bf16.msra.mxu1 %v1717_v29 }
 0x119   :  { %1719 = vmatprep.subr.bf16.mxu1 %v1860_v0 }
 0x11c   :  { %1721 = vmatpush3.bf16.msra.mxu1 %v1720_v38  ;;  %v1985_v38 = vld [vmem:[%s2066_s2 + $0xb] ss:$0 sm:$0xff] }
 0x11d   :  { %1722 = vmatprep.subr.bf16.mxu1 %v1860_v0 }
 0x120   :  { %1724 = vmatpush3.bf16.msra.mxu1 %v1723_v47 }
 0x121   :  { %1725 = vmatprep.subr.bf16.mxu1 %v1860_v0 }
 0x1e2   :  { %v250_v58 = vpop.f32.mrb[0].mxu1 }
 0x1e3   :  { %v251_v59 = vadd.f32 %v1298_v57, %v250_v58  ;;  %v1484_v60 = vpop.f32.mrb[1].mxu1  ;;  %v1700_v57 = vpack.c.bf16 %v312_v52, %v309_v50  ;;  %v1726_v58 = vpack.c.bf16 %v314_v54, %v311_v53 }
 0x1e4   :  { %v315_v60 = vld [vmem:[#allocation2 + $0x2b0] sm:$0xff] }
 0x1e5   :  { %254 = vadd.xlane.f32.xlu0 %v251_v59  ;;  %1701 = vmatpush1.bf16.msra.mxu0 %v1700_v57  ;;  %v1704_v4 = vpack.c.bf16 %v318_v61, %v315_v60 }
 0x1e6   :  { %1727 = vmatpush3.bf16.msra.mxu1 %v1726_v58 }
 0x1e7   :  { %1728 = vmatprep.subr.bf16.mxu1 %v1860_v0 }
 0x1ea   :  { %1730 = vmatpush3.bf16.msra.mxu1 %v1729_v5 }
 0x1eb   :  { %1731 = vmatprep.subr.bf16.mxu1 %v1860_v0 }
 0x1ee   :  { %1733 = vmatpush3.bf16.msra.mxu1 %v1732_v12  ;;  %v71_v12 = vld [vmem:[#allocation2 + $0x28] sm:$0xff] }
 0x1ef   :  { %1525 = vmatprep.subr.mxu1 %v1862_v1 }
 0x272   :  { %v255_v17 = vpop.xlane.xlu0 %254 }
 0x273   :  { %v257_v18 = vmul.f32 0.0078125, %v255_v17  ;;  %v1299_v17 = vld [vmem:[%s2066_s2 + $0x2] ss:$0 sm:$0xff] }
 0x275   :  { %v1931_v19 = vsub.f32 %v251_v59, %v257_v18  ;;  %v1702_v59 = vpack.c.bf16 %v319_v56, %v316_v55 }
 0x277   :  { %v259_v20 = vmul.f32 %v1931_v19, %v1931_v19  ;;  %1703 = vmatprep.subr.bf16.mxu0 %v1702_v59 }
 0x278   :  { %1705 = vmatpush1.bf16.msra.mxu0 %v1704_v4 }
 0x279   :  { %260 = vadd.xlane.f32.xlu0 %v259_v20  ;;  %1707 = vmatprep.subr.bf16.mxu0 %v1706_v6  ;;  %v1300_v20 = vld [vmem:[%s2066_s2 + $0x3] ss:$0 sm:$0xff] }
 0x27c   :  { %1709 = vmatpush1.bf16.msra.mxu0 %v1708_v11 }
 0x27d   :  { %1520 = vmatprep.subr.mxu0 %v1862_v1 }
 0x306   :  { %v261_v13 = vpop.xlane.xlu0 %260 }
 0x307   :  { %v262_v14 = vmul.f32 0.0078125, %v261_v13  ;;  %v72_v13 = vld [vmem:[#allocation2 + $0x60] sm:$0xff] }
 0x309   :  { %v263_v15 = vadd.f32 0.0001, %v262_v14  ;;  %v73_v14 = vld [vmem:[#allocation2 + $0x98] sm:$0xff] }
 0x30b   :  { %1789 = vrsqrt.f32 %v263_v15  ;;  %v1735_v15 = vpack.c.bf16 %v72_v13, %v71_v12 }
 0x315   :  { %v1790_v16 = vpop.eup %1789 }
 0x316   :  { %v265_v18 = vmul.f32 %v1790_v16, %v1931_v19  ;;  %v1301_v19 = vld [vmem:[%s2066_s2 + $0x4] ss:$0 sm:$0xff]  ;;  %v74_v16 = vld [vmem:[#allocation2 + $0xd0] sm:$0xff] }
 0x318   :  { %v270_v21 = vmul.f32 %v1299_v17, %v265_v18  ;;  %v1738_v17 = vpack.c.bf16 %v74_v16, %v73_v14  ;;  %v75_v18 = vld [vmem:[#allocation2 + $0x108] sm:$0xff] }
 0x31a   :  { %v275_v22 = vadd.f32 %v1300_v20, %v270_v21  ;;  %v76_v20 = vld [vmem:[#allocation2 + $0x140] sm:$0xff] }
 0x31b   :  { %v1741_v21 = vpack.c.bf16 %v76_v20, %v75_v18 }
 0x31c   :  { %vm276_vm2 = vcmp.gt.f32.partialorder %v275_v22, 0.0  ;;  %v277_v23 = vmul.f32 0.01, %v275_v22 }
 0x31e   :  { %v278_v24 = vsel %vm276_vm2, %v275_v22, %v277_v23  ;;  %v77_v22 = vld [vmem:[#allocation2 + $0x178] sm:$0xff]  ;;  %v78_v23 = vld [vmem:[#allocation2 + $0x1b0] sm:$0xff] }
 0x31f   :  { %392 = vmatmul.mubr.f32.vlgmr.msra.gmra.mrb[2].mxu0 %v278_v24  ;;  %1518 = vmatmul.mubr.f32.vlgmr.msra.gmra.mrb[2].mxu1 %v278_v24  ;;  %v1744_v24 = vpack.c.bf16 %v78_v23, %v77_v22 }
 0x320   :  { %1522 = vmatprep.mubr.msk.f32.mxu0 %vm1861_vm0, %v1862_v1  ;;  %1527 = vmatprep.mubr.msk.f32.mxu1 %vm1861_vm0, %v1862_v1 }
 0x3f2   :  { %v393_v27 = vpop.f32.mrb[2].mxu0  ;;  %v464_v28 = vpop.f32.mrb[2].mxu1 }
 0x3f3   :  { %v472_v29 = vadd.f32 %v1301_v19, %v393_v27  ;;  %v1962_v30 = vadd.f32 %v1303_v25, %v464_v28  ;;  %v395_v31 = vpop.f32.mrb[3].mxu0  ;;  %v1519_v32 = vpop.f32.mrb[3].mxu1 }
 0x3f4   :  { %v477_v33 = vadd.f32 %v1302_v26, %v395_v31 }
 0x3f5   :  { %1526 = vmatpush3.msra.mxu1 %v1962_v30  ;;  %v488_v35 = vmul.f32 %v1967_v34, %v472_v29  ;;  %v651_v37 = vmul.f32 %v1976_v36, %v472_v29  ;;  %v813_v39 = vmul.f32 %v1985_v38, %v472_v29  ;;  %v975_v41 = vmul.f32 %v1994_v40, %v472_v29 }
 0x3f6   :  { %1521 = vmatpush3.xpose.msra.mxu0 %v477_v33  ;;  %1535 = vmatprep.subr.mxu1 %v1862_v1 }
 0x3f7   :  { %1530 = vmatprep.subr.mxu0 %v1862_v1 }
 0x3f9   :  { %1523 = vmatmul.mubr.f32.vlgmr.msra.gmra.mrb[4].mxu0 %v488_v35 }
 0x3fa   :  { %1531 = vmatpush3.xpose.msra.mxu0 %v477_v33  ;;  %1532 = vmatprep.mubr.msk.f32.mxu0 %vm1861_vm0, %v1862_v1 }
 0x3fb   :  { %1540 = vmatprep.subr.mxu0 %v1862_v1 }
 0x3fd   :  { %1533 = vmatmul.mubr.f32.vlgmr.msra.gmra.mrb[6].mxu0 %v651_v37 }
 0x3fe   :  { %1541 = vmatpush3.xpose.msra.mxu0 %v477_v33  ;;  %1542 = vmatprep.mubr.msk.f32.mxu0 %vm1861_vm0, %v1862_v1 }
 0x3ff   :  { %1550 = vmatprep.subr.mxu0 %v1862_v1 }
 0x401   :  { %1543 = vmatmul.mubr.f32.vlgmr.msra.gmra.mrb[8].mxu0 %v813_v39 }
 0x402   :  { %1551 = vmatpush3.xpose.msra.mxu0 %v477_v33  ;;  %1552 = vmatprep.mubr.msk.f32.mxu0 %vm1861_vm0, %v1862_v1 }
 0x403   :  { %1734 = vmatprep.subr.bf16.mxu0 %v1860_v0 }
 0x405   :  { %1553 = vmatmul.mubr.f32.vlgmr.msra.gmra.mrb[10].mxu0 %v975_v41  ;;  %v79_v41 = vld [vmem:[#allocation2 + $0x1e8] sm:$0xff] }
 0x406   :  { %1592 = vmatprep.mubr.msk.f32.mxu0 %vm1861_vm0, %v1862_v1  ;;  %1736 = vmatpush3.bf16.msra.mxu0 %v1735_v15 }
 0x407   :  { %1737 = vmatprep.subr.bf16.mxu0 %v1860_v0 }
 0x40a   :  { %1739 = vmatpush3.bf16.msra.mxu0 %v1738_v17 }
 0x40b   :  { %1740 = vmatprep.subr.bf16.mxu0 %v1860_v0 }
 0x40e   :  { %1742 = vmatpush3.bf16.msra.mxu0 %v1741_v21 }
 0x40f   :  { %1743 = vmatprep.subr.bf16.mxu0 %v1860_v0 }
 0x412   :  { %1745 = vmatpush3.bf16.msra.mxu0 %v1744_v24 }
 0x413   :  { %1746 = vmatprep.subr.bf16.mxu0 %v1860_v0 }
 0x4cc   :  { %v555_v42 = vpop.f32.mrb[4].mxu0 }
 0x4cd   :  { %v1524_v43 = vpop.f32.mrb[5].mxu0  ;;  %v560_v44 = vsel %vm559_vm3, %v555_v42, -inf }
 0x4ce   :  { %561 = vmax.xlane.f32.xlu1 %v560_v44  ;;  %v81_v44 = vld [vmem:[#allocation2 + $0x258] sm:$0xff] }
 0x4d0   :  { %v718_v45 = vpop.f32.mrb[6].mxu0 }
 0x4d1   :  { %v1534_v46 = vpop.f32.mrb[7].mxu0  ;;  %v722_v47 = vsel %vm559_vm3, %v718_v45, -inf }
 0x4d2   :  { %723 = vmax.xlane.f32.xlu1 %v722_v47  ;;  %v83_v46 = vld [vmem:[#allocation2 + $0x2c8] sm:$0xff]  ;;  %v84_v47 = vld [vmem:[#allocation2 + $0x300] sm:$0xff] }
 0x4d4   :  { %v880_v48 = vpop.f32.mrb[8].mxu0 }
 0x4d5   :  { %v1544_v49 = vpop.f32.mrb[9].mxu0  ;;  %v884_v50 = vsel %vm559_vm3, %v880_v48, -inf }
 0x4d6   :  { %885 = vmax.xlane.f32.xlu0 %v884_v50  ;;  %v85_v49 = vld [vmem:[#allocation2 + $0x338] sm:$0xff] }
 0x4d8   :  { %v1042_v51 = vpop.f32.mrb[10].mxu0 }
 0x4d9   :  { %v1554_v52 = vpop.f32.mrb[11].mxu0  ;;  %v1046_v53 = vsel %vm559_vm3, %v1042_v51, -inf }
 0x4da   :  { %1047 = vmax.xlane.f32.xlu1 %v1046_v53  ;;  %v88_v52 = vld [vmem:[#allocation2 + $0x68] sm:$0xff]  ;;  %v89_v53 = vld [vmem:[#allocation2 + $0xa0] sm:$0xff] }
 0x55b   :  { %v562_v54 = vpop.xlane.xlu1 %561 }
 0x55c   :  { %v563_v55 = vsub.f32 %v555_v42, %v562_v54  ;;  %v80_v42 = vld [vmem:[#allocation2 + $0x220] sm:$0xff] }
 0x55d   :  { %v1747_v43 = vpack.c.bf16 %v80_v42, %v79_v41 }
 0x55e   :  { %v564_v56 = vmul.f32 1.442695, %v563_v55  ;;  %v90_v55 = vld [vmem:[#allocation2 + $0xd8] sm:$0xff] }
 0x55f   :  { %v724_v57 = vpop.xlane.xlu1 %723  ;;  %1748 = vmatpush3.bf16.msra.mxu0 %v1747_v43 }
 0x560   :  { %1791 = vpow2.f32 %v564_v56  ;;  %v725_v58 = vsub.f32 %v718_v45, %v724_v57  ;;  %1749 = vmatprep.subr.bf16.mxu0 %v1860_v0  ;;  %v82_v45 = vld [vmem:[#allocation2 + $0x290] sm:$0xff]  ;;  %v1762_v56 = vpack.c.bf16 %v90_v55, %v89_v53 }
 0x561   :  { %v91_v57 = vld [vmem:[#allocation2 + $0x110] sm:$0xff] }
 0x562   :  { %v726_v59 = vmul.f32 1.442695, %v725_v58  ;;  %v92_v58 = vld [vmem:[#allocation2 + $0x148] sm:$0xff] }
 0x563   :  { %v886_v60 = vpop.xlane.xlu0 %885 }
 0x564   :  { %1793 = vpow2.f32 %v726_v59  ;;  %v887_v61 = vsub.f32 %v880_v48, %v886_v60  ;;  %v1753_v48 = vpack.c.bf16 %v84_v47, %v83_v46  ;;  %v1765_v59 = vpack.c.bf16 %v92_v58, %v91_v57  ;;  %v93_v60 = vld [vmem:[#allocation2 + $0x180] sm:$0xff] }
 0x566   :  { %v888_v62 = vmul.f32 1.442695, %v887_v61  ;;  %v94_v61 = vld [vmem:[#allocation2 + $0x1b8] sm:$0xff] }
 0x567   :  { %v1048_v63 = vpop.xlane.xlu1 %1047 }
 0x568   :  { %1795 = vpow2.f32 %v888_v62  ;;  %v1049_v2 = vsub.f32 %v1042_v51, %v1048_v63  ;;  %v87_v51 = vld [vmem:[#allocation2 + $0x30] sm:$0xff]  ;;  %v1768_v62 = vpack.c.bf16 %v94_v61, %v93_v60 }
 0x569   :  { %v1759_v54 = vpack.c.bf16 %v88_v52, %v87_v51  ;;  %v95_v63 = vld [vmem:[#allocation2 + $0x1f0] sm:$0xff] }
 0x56a   :  { %v1792_v3 = vpop.eup %1791  ;;  %v1050_v4 = vmul.f32 1.442695, %v1049_v2  ;;  %v96_v2 = vld [vmem:[#allocation2 + $0x228] sm:$0xff] }
 0x56b   :  { %v566_v5 = vsel %vm559_vm3, %v1792_v3, 0.0 }
 0x56c   :  { %1797 = vpow2.f32 %v1050_v4  ;;  %567 = vadd.xlane.f32.xlu0 %v566_v5  ;;  %v97_v4 = vld [vmem:[#allocation2 + $0x260] sm:$0xff]  ;;  %v98_v5 = vld [vmem:[#allocation2 + $0x298] sm:$0xff] }
 0x56e   :  { %v1794_v6 = vpop.eup %1793 }
 0x56f   :  { %v728_v7 = vsel %vm559_vm3, %v1794_v6, 0.0 }
 0x570   :  { %729 = vadd.xlane.f32.xlu1 %v728_v7  ;;  %v99_v7 = vld [vmem:[#allocation2 + $0x2d0] sm:$0xff] }
 0x572   :  { %v1796_v8 = vpop.eup %1795 }
 0x573   :  { %v890_v9 = vsel %vm559_vm3, %v1796_v8, 0.0 }
 0x574   :  { %891 = vadd.xlane.f32.xlu0 %v890_v9 }
 0x576   :  { %v1798_v10 = vpop.eup %1797 }
 0x577   :  { %v1052_v11 = vsel %vm559_vm3, %v1798_v10, 0.0 }
 0x578   :  { %1053 = vadd.xlane.f32.xlu1 %v1052_v11 }
 0x5f9   :  { %v568_v19 = vpop.xlane.xlu0 %567 }
 0x5fa   :  { %1799 = vrcp.f32 %v568_v19 }
 0x5fd   :  { %v730_v25 = vpop.xlane.xlu1 %729 }
 0x5fe   :  { %1801 = vrcp.f32 %v730_v25  ;;  %v102_v25 = vld [vmem:[#allocation2 + $0x378] sm:$0xff] }
 0x601   :  { %v892_v26 = vpop.xlane.xlu0 %891 }
 0x602   :  { %1803 = vrcp.f32 %v892_v26 }
 0x604   :  { %v1800_v27 = vpop.eup %1799 }
 0x605   :  { %v570_v28 = vmul.f32 %v1800_v27, %v1792_v3  ;;  %v1054_v29 = vpop.xlane.xlu1 %1053  ;;  %v1771_v3 = vpack.c.bf16 %v96_v2, %v95_v63 }
 0x606   :  { %1805 = vrcp.f32 %v1054_v29 }
 0x607   :  { %1528 = vmatmul.mubr.msk.f32.vlgmr.msra.gmra.mrb[4].mxu1 %vm559_vm3, %v570_v28 }
 0x608   :  { %v1802_v31 = vpop.eup %1801  ;;  %1536 = vmatpush3.msra.mxu1 %v1962_v30  ;;  %1537 = vmatprep.mubr.msk.f32.mxu1 %vm1861_vm0, %v1862_v1 }
 0x609   :  { %v732_v32 = vmul.f32 %v1802_v31, %v1794_v6  ;;  %1545 = vmatprep.subr.mxu1 %v1862_v1  ;;  %v1774_v6 = vpack.c.bf16 %v98_v5, %v97_v4 }
 0x60b   :  { %1538 = vmatmul.mubr.msk.f32.vlgmr.msra.gmra.mrb[6].mxu1 %vm559_vm3, %v732_v32 }
 0x60c   :  { %v1804_v33 = vpop.eup %1803  ;;  %1546 = vmatpush3.msra.mxu1 %v1962_v30  ;;  %1547 = vmatprep.mubr.msk.f32.mxu1 %vm1861_vm0, %v1862_v1 }
 0x60d   :  { %v894_v35 = vmul.f32 %v1804_v33, %v1796_v8  ;;  %1555 = vmatprep.subr.mxu1 %v1862_v1  ;;  %v100_v8 = vld [vmem:[#allocation2 + $0x308] sm:$0xff] }
 0x60e   :  { %v1777_v9 = vpack.c.bf16 %v100_v8, %v99_v7 }
 0x60f   :  { %1548 = vmatmul.mubr.msk.f32.vlgmr.msra.gmra.mrb[8].mxu1 %vm559_vm3, %v894_v35 }
 0x610   :  { %v1806_v37 = vpop.eup %1805  ;;  %1556 = vmatpush3.msra.mxu1 %v1962_v30  ;;  %1557 = vmatprep.mubr.msk.f32.mxu1 %vm1861_vm0, %v1862_v1  ;;  %v1750_v30 = vpack.c.bf16 %v82_v45, %v81_v44 }
 0x611   :  { %v1056_v39 = vmul.f32 %v1806_v37, %v1798_v10  ;;  %1758 = vmatprep.subr.bf16.mxu1 %v1860_v0 }
 0x612   :  { %1751 = vmatpush3.bf16.msra.mxu0 %v1750_v30 }
 0x613   :  { %1558 = vmatmul.mubr.msk.f32.vlgmr.msra.gmra.mrb[10].mxu1 %vm559_vm3, %v1056_v39  ;;  %1752 = vmatprep.subr.bf16.mxu0 %v1860_v0 }
 0x614   :  { %1627 = vmatprep.mubr.msk.f32.mxu1 %vm1861_vm0, %v1862_v1  ;;  %v86_v1 = vld [vmem:[#allocation2 + $0x370] sm:$0xff]  ;;  %1760 = vmatpush3.bf16.msra.mxu1 %v1759_v54 }
 0x615   :  { %v1756_v50 = vpack.c.bf16 %v86_v1, %v85_v49  ;;  %1761 = vmatprep.subr.bf16.mxu1 %v1860_v0 }
 0x616   :  { %1754 = vmatpush3.bf16.msra.mxu0 %v1753_v48 }
 0x617   :  { %1755 = vmatprep.subr.bf16.mxu0 %v1860_v0 }
 0x618   :  { %1763 = vmatpush3.bf16.msra.mxu1 %v1762_v56 }
 0x619   :  { %1764 = vmatprep.subr.bf16.mxu1 %v1860_v0 }
 0x61a   :  { %1757 = vmatpush3.bf16.msra.mxu0 %v1756_v50 }
 0x61c   :  { %1766 = vmatpush3.bf16.msra.mxu1 %v1765_v59 }
 0x61d   :  { %1767 = vmatprep.subr.bf16.mxu1 %v1860_v0 }
 0x620   :  { %1769 = vmatpush3.bf16.msra.mxu1 %v1768_v62 }
 0x621   :  { %1770 = vmatprep.subr.bf16.mxu1 %v1860_v0 }
 0x624   :  { %1772 = vmatpush3.bf16.msra.mxu1 %v1771_v3 }
 0x625   :  { %1773 = vmatprep.subr.bf16.mxu1 %v1860_v0 }
 0x628   :  { %1775 = vmatpush3.bf16.msra.mxu1 %v1774_v6 }
 0x629   :  { %1776 = vmatprep.subr.bf16.mxu1 %v1860_v0 }
 0x62c   :  { %1778 = vmatpush3.bf16.msra.mxu1 %v1777_v9 }
 0x62d   :  { %1779 = vmatprep.subr.bf16.mxu1 %v1860_v0  ;;  %v101_v0 = vld [vmem:[#allocation2 + $0x340] sm:$0xff] }
 0x62e   :  { %v1780_v26 = vpack.c.bf16 %v102_v25, %v101_v0 }
 0x630   :  { %1781 = vmatpush3.bf16.msra.mxu1 %v1780_v26 }
 0x6da   :  { %v640_v10 = vpop.f32.mrb[4].mxu1 }
 0x6db   :  { %v1529_v11 = vpop.f32.mrb[5].mxu1  ;;  %v644_v13 = vmul.f32 %v1967_v34, %v640_v10  ;;  %v1312_v34 = vld [vmem:[%s2066_s2 + $0x7] ss:$0 sm:$0xff] }
 0x6de   :  { %v802_v12 = vpop.f32.mrb[6].mxu1 }
 0x6df   :  { %v806_v14 = vmul.f32 %v1976_v36, %v802_v12  ;;  %v1539_v15 = vpop.f32.mrb[7].mxu1 }
 0x6e1   :  { %v807_v16 = vadd.f32 %v806_v14, %v644_v13 }
 0x6e2   :  { %v964_v17 = vpop.f32.mrb[8].mxu1 }
 0x6e3   :  { %v968_v18 = vmul.f32 %v1985_v38, %v964_v17  ;;  %v1549_v20 = vpop.f32.mrb[9].mxu1  ;;  %v1313_v38 = vld [vmem:[%s2066_s2 + $0x8] ss:$0 sm:$0xff] }
 0x6e5   :  { %v969_v21 = vadd.f32 %v968_v18, %v807_v16 }
 0x6e6   :  { %v1126_v22 = vpop.f32.mrb[10].mxu1 }
 0x6e7   :  { %v1130_v23 = vmul.f32 %v1994_v40, %v1126_v22  ;;  %v1559_v24 = vpop.f32.mrb[11].mxu1 }
 0x6e9   :  { %v1131_v19 = vadd.f32 %v1130_v23, %v969_v21 }
 0x6eb   :  { %1593 = vmatmul.mubr.f32.vlgmr.msra.gmra.mrb[12].mxu0 %v1131_v19 }
 0x7be   :  { %v1202_v36 = vpop.f32.mrb[12].mxu0 }
 0x7bf   :  { %v1203_v27 = vadd.f32 %v1312_v34, %v1202_v36  ;;  %v1594_v28 = vpop.f32.mrb[13].mxu0 }
 0x7c1   :  { %1628 = vmatmul.mubr.f32.vlgmr.msra.gmra.mrb[12].mxu1 %v1203_v27 }
 0x894   :  { %v1276_v40 = vpop.f32.mrb[12].mxu1 }
 0x895   :  { %v1277_v29 = vadd.f32 %v1313_v38, %v1276_v40  ;;  %v1629_v31 = vpop.f32.mrb[13].mxu1 }
 0x897   :  { %1807 = vtanh.f32 %v1277_v29 }
 0x8a1   :  { %v1808_v32 = vpop.eup %1807 }
 0x8a2   :  { %1281 = vst [vmem:[#allocation5] sm:$0xff] %v1808_v32 }
 0x8a3   :  { %1842 = shalt.err (!%p1839_p12)
}
 0x8a4   :  { %s1843_s2 = scalar_lea.hbm %s2067_s3, 128 }
 0x8a5   :  { %p1844_p13 = scmp.ne.s32.totalorder %s2067_s3, %s1843_s2  ;;  %p1847_p0 = scmp.lt.u32.totalorder %s1843_s2, %s2067_s3 }
 0x8a7   :  { %p1849_p1 = pnand %p1847_p0, %p1844_p13 }
 0x8a9   :  { %1852 = shalt.err (!%p1849_p1)
}
 0x8aa   :  { %1291 = dma.vmem_to_hbm [thread:$0]  %s1289_s1, 128, %s2067_s3, [#allocation4]  }
 0x8ab   :  { %1855 = dma.done.wait [#allocation4], 128  }
 0x8ac   :  { %1856 = vsyncadd [#allocation4], 4294967168 }
 0x8ad   :  { %1295 = vsyncpa [#allocation3], 1 }
 0x8ae   :  { %1296 = vsyncpa [#allocation4], 1 }

</bundles_post_ra>
